<compile_context>
chip_gen: v7x
topology: tpu7x:2x2x1
jax: 0.10.0
libtpu: 0.0.40
codegen_flags: <defaults>
</compile_context>

<pallas_src>
import jax
import jax.numpy as jnp
import numpy as np
from jax.experimental import pallas as pl
from jax.experimental.pallas import tpu as pltpu


def combine_kernel(c_ref, add_ref, mul_ref, neg_ref):
    """Broadcast-combine two ConstantFunction rows into three output tiles.

    c_ref   : (2, LANE) lane-packed constant rows (row 0 = c1, row 1 = c2).
    add_ref : (tile_rows, LANE)  AddedFunction       -> c1 + c2
    mul_ref : (tile_rows, LANE)  MultipliedFunction  -> c1 * c2
    neg_ref : (tile_rows, LANE)  __neg__ (f1 * -1)   -> -c1
    The point values are semantically ignored, so they are never loaded.
    """
    c1 = c_ref[0:1, :]                        # (1, LANE)
    c2 = c_ref[1:2, :]                        # (1, LANE)
    tile_shape = add_ref.shape                # (tile_rows, LANE)

    add_ref[...] = jnp.broadcast_to(c1 + c2, tile_shape)
    mul_ref[...] = jnp.broadcast_to(c1 * c2, tile_shape)
    neg_ref[...] = jnp.broadcast_to(-c1, tile_shape)


def _ceil_to(x, m):
    return -(-x // m) * m


def _floor_to(x, m):
    return (x // m) * m


def function_forward(states, actions, c1, c2, *, max_tile_rows=8192):
    """Reproduce the composed build_evaluation paths.

    - @concatenate_inputs only determines the batch shape here (constants
      ignore point values), so no concatenation / no points DMA is done.
    - Returns (added, multiplied, negated), each (N, D), D = Ds + Da.
    """
    n = states.shape[0]
    d = states.shape[1] + actions.shape[1]
    assert c1.shape == (1, d) and c2.shape == (1, d)
    dtype = c1.dtype
    itemsize = jnp.dtype(dtype).itemsize

    # ---- Lane layout: always store full 128-lane-multiple rows. ------------
    if d <= 128 and 128 % d == 0:
        pack = 128 // d            # pack consecutive batch rows into one vreg row
        lane_w = 128
        pad_lanes = 0
    else:
        pack = 1
        lane_w = _ceil_to(d, 128)  # pad lanes instead of masked partial stores
        pad_lanes = lane_w - d

    rows = -(-n // pack)                              # packed rows (ceil)

    # ---- Tile-row selection (multiple of 8, VMEM-budgeted, megacore). ------
    max_tile_rows = max(8, _ceil_to(int(max_tile_rows), 8))
    vmem_budget = 24 * 1024 * 1024                    # headroom under 32 MiB scoped default
    rows_by_vmem = max(8, _floor_to(vmem_budget // (2 * 3 * lane_w * itemsize), 8))
    max_tile_rows = min(max_tile_rows, rows_by_vmem)

    if rows > max_tile_rows:
        tile_rows = max_tile_rows                     # multiple of 8
    elif rows >= 64:
        # Split into >= 2 grid steps so both v7x TensorCores get work.
        tile_rows = min(max_tile_rows, _ceil_to(-(-rows // 2), 8))
    else:
        tile_rows = rows                              # block == full row dim -> legal
    grid = (pl.cdiv(rows, tile_rows),)

    # ---- Single tiny (2, lane_w) constant input (fetched once). ------------
    c = jnp.concatenate([c1, c2], axis=0)             # (2, d)
    if pack > 1:
        c = jnp.tile(c, (1, pack))                    # (2, 128)
    elif pad_lanes:
        c = jnp.pad(c, ((0, 0), (0, pad_lanes)))      # (2, lane_w)

    out_sds = jax.ShapeDtypeStruct((rows, lane_w), dtype)
    out_spec = pl.BlockSpec((tile_rows, lane_w), lambda i: (i, 0))

    added, multiplied, negated = pl.pallas_call(
        combine_kernel,
        out_shape=(out_sds, out_sds, out_sds),
        grid=grid,
        in_specs=[pl.BlockSpec((2, lane_w), lambda i: (0, 0))],
        out_specs=(out_spec, out_spec, out_spec),
        compiler_params=pltpu.CompilerParams(
            dimension_semantics=("parallel",),
        ),
    )(c)

    # ---- Layout plumbing back to (N, D). -----------------------------------
    if pack > 1:
        def unpack(y):
            y = y.reshape(rows * pack, d)             # contiguous reshape (free)
            return y[:n] if rows * pack != n else y
        return unpack(added), unpack(multiplied), unpack(negated)
    if pad_lanes:
        return added[:, :d], multiplied[:, :d], negated[:, :d]
    return added, multiplied, negated


def _reference(n, c1, c2):
    c1_np, c2_np = np.asarray(c1), np.asarray(c2)
    d = c1_np.shape[1]
    return (np.broadcast_to(c1_np + c2_np, (n, d)),
            np.broadcast_to(c1_np * c2_np, (n, d)),
            np.broadcast_to(-c1_np, (n, d)))


def _check(outs, n, c1, c2):
    ref_add, ref_mul, ref_neg = _reference(n, c1, c2)
    np.testing.assert_allclose(np.asarray(outs[0]), ref_add, rtol=1e-6, atol=1e-6)
    np.testing.assert_allclose(np.asarray(outs[1]), ref_mul, rtol=1e-6, atol=1e-6)
    np.testing.assert_allclose(np.asarray(outs[2]), ref_neg, rtol=1e-6, atol=1e-6)


if __name__ == "__main__":
    key = jax.random.PRNGKey(0)
    k_states, k_actions, k_c1, k_c2 = jax.random.split(key, 4)

    # Small shapes: batch=16 points, state dim 24 + action dim 8 -> D=32.
    N, D_STATE, D_ACTION = 16, 24, 8
    D = D_STATE + D_ACTION

    states = jax.random.normal(k_states, (N, D_STATE), dtype=jnp.float32)
    actions = jax.random.normal(k_actions, (N, D_ACTION), dtype=jnp.float32)

    # Deterministic "constant" parameters of the two ConstantFunctions.
    c1 = jax.random.normal(k_c1, (1, D), dtype=jnp.float32)
    c2 = jax.random.normal(k_c2, (1, D), dtype=jnp.float32)

    outs = function_forward(states, actions, c1, c2)
    jax.block_until_ready(outs)
    _check(outs, N, c1, c2)

    # Remainder path: batch not divisible by the lane-packing factor.
    N2 = 10
    s2 = jax.random.normal(k_states, (N2, D_STATE), dtype=jnp.float32)
    a2 = jax.random.normal(k_actions, (N2, D_ACTION), dtype=jnp.float32)
    outs2 = function_forward(s2, a2, c1, c2)
    jax.block_until_ready(outs2)
    _check(outs2, N2, c1, c2)

    # Multi-step grid path with a ragged final block (small max_tile_rows).
    N3 = 80
    s3 = jax.random.normal(k_states, (N3, D_STATE), dtype=jnp.float32)
    a3 = jax.random.normal(k_actions, (N3, D_ACTION), dtype=jnp.float32)
    outs3 = function_forward(s3, a3, c1, c2, max_tile_rows=8)
    jax.block_until_ready(outs3)
    _check(outs3, N3, c1, c2)

    # Non-divisor D fallback: D=40 -> lane-padded to 128, sliced in wrapper.
    N4, DS4, DA4 = 12, 30, 10
    s4 = jax.random.normal(k_states, (N4, DS4), dtype=jnp.float32)
    a4 = jax.random.normal(k_actions, (N4, DA4), dtype=jnp.float32)
    c1b = jax.random.normal(k_c1, (1, DS4 + DA4), dtype=jnp.float32)
    c2b = jax.random.normal(k_c2, (1, DS4 + DA4), dtype=jnp.float32)
    outs4 = function_forward(s4, a4, c1b, c2b)
    jax.block_until_ready(outs4)
    _check(outs4, N4, c1b, c2b)

    # Mid-size N: exercises the >=2-step (megacore) split path.
    N5 = 512
    s5 = jax.random.normal(k_states, (N5, D_STATE), dtype=jnp.float32)
    a5 = jax.random.normal(k_actions, (N5, D_ACTION), dtype=jnp.float32)
    outs5 = function_forward(s5, a5, c1, c2)
    jax.block_until_ready(outs5)
    _check(outs5, N5, c1, c2)

    # TODO(synk): the base-class `forward` returns a bare scalar attribute and
    # `__call__` / copy_parameters are parameter-management templates in the
    # reference; only the composed build_evaluation paths have compute.
    print("KERNEL_OK")
</pallas_src>

<mosaic_0001>
module attributes {stable_mosaic.version = 11 : i64} {
  func.func @combine_kernel(%arg0: i32, %arg1: memref<2x128xf32, #tpu.memory_space<vmem>>, %arg2: memref<4x128xf32, #tpu.memory_space<vmem>>, %arg3: memref<4x128xf32, #tpu.memory_space<vmem>>, %arg4: memref<4x128xf32, #tpu.memory_space<vmem>>) attributes {dimension_semantics = [#tpu.dimension_semantics<parallel>], iteration_bounds = array<i64: 1>, scalar_prefetch = 0 : i64, scratch_operands = 0 : i64, tpu.core_type = #tpu.core_type<tc>, window_params = [{pipeline_mode = #tpu.pipeline_mode<synchronous>, transform_indices = @transform_0, window_bounds = array<i64: 2, 128>}, {transform_indices = @transform_1, window_bounds = array<i64: 4, 128>}, {transform_indices = @transform_2, window_bounds = array<i64: 4, 128>}, {transform_indices = @transform_3, window_bounds = array<i64: 4, 128>}]} {
    %c0 = arith.constant 0 : index
    %c0_0 = arith.constant 0 : index
    %0 = vector.load %arg1[%c0, %c0_0] : memref<2x128xf32, #tpu.memory_space<vmem>>, vector<1x128xf32>
    %c1 = arith.constant 1 : index
    %c0_1 = arith.constant 0 : index
    %1 = vector.load %arg1[%c1, %c0_1] : memref<2x128xf32, #tpu.memory_space<vmem>>, vector<1x128xf32>
    %2 = arith.addf %0, %1 : vector<1x128xf32>
    %3 = vector.shape_cast %2 : vector<1x128xf32> to vector<1x128xf32>
    %4 = vector.broadcast %3 : vector<1x128xf32> to vector<4x128xf32>
    %c0_2 = arith.constant 0 : index
    %c0_3 = arith.constant 0 : index
    %5 = vector.load %arg2[%c0_2, %c0_3] : memref<4x128xf32, #tpu.memory_space<vmem>>, vector<4x128xf32>
    tpu.vector_store %arg2[%c0_2, %c0_3], %4 {strides = array<i32>} : memref<4x128xf32, #tpu.memory_space<vmem>>, vector<4x128xf32>,
    %6 = arith.mulf %0, %1 : vector<1x128xf32>
    %7 = vector.shape_cast %6 : vector<1x128xf32> to vector<1x128xf32>
    %8 = vector.broadcast %7 : vector<1x128xf32> to vector<4x128xf32>
    %c0_4 = arith.constant 0 : index
    %c0_5 = arith.constant 0 : index
    %9 = vector.load %arg3[%c0_4, %c0_5] : memref<4x128xf32, #tpu.memory_space<vmem>>, vector<4x128xf32>
    tpu.vector_store %arg3[%c0_4, %c0_5], %8 {strides = array<i32>} : memref<4x128xf32, #tpu.memory_space<vmem>>, vector<4x128xf32>,
    %cst = arith.constant 0.000000e+00 : f32
    %10 = vector.broadcast %cst : f32 to vector<1x128xf32>
    %11 = arith.subf %10, %0 : vector<1x128xf32>
    %12 = vector.shape_cast %11 : vector<1x128xf32> to vector<1x128xf32>
    %13 = vector.broadcast %12 : vector<1x128xf32> to vector<4x128xf32>
    %c0_6 = arith.constant 0 : index
    %c0_7 = arith.constant 0 : index
    %14 = vector.load %arg4[%c0_6, %c0_7] : memref<4x128xf32, #tpu.memory_space<vmem>>, vector<4x128xf32>
    tpu.vector_store %arg4[%c0_6, %c0_7], %13 {strides = array<i32>} : memref<4x128xf32, #tpu.memory_space<vmem>>, vector<4x128xf32>,
    return
  }
  func.func @transform_0(%arg0: i32) -> (i32, i32) {
    %c0_i32 = arith.constant 0 : i32
    %c0_i32_0 = arith.constant 0 : i32
    %c0_i32_1 = arith.constant 0 : i32
    return %c0_i32, %c0_i32_0 : i32, i32
  }
  func.func @transform_1(%arg0: i32) -> (i32, i32) {
    %c0_i32 = arith.constant 0 : i32
    %c0_i32_0 = arith.constant 0 : i32
    return %arg0, %c0_i32 : i32, i32
  }
  func.func @transform_2(%arg0: i32) -> (i32, i32) {
    %c0_i32 = arith.constant 0 : i32
    %c0_i32_0 = arith.constant 0 : i32
    return %arg0, %c0_i32 : i32, i32
  }
  func.func @transform_3(%arg0: i32) -> (i32, i32) {
    %c0_i32 = arith.constant 0 : i32
    %c0_i32_0 = arith.constant 0 : i32
    return %arg0, %c0_i32 : i32, i32
  }
}

</mosaic_0001>

<bundles_post_ra>
// kernel: tpu_custom_call.1
= control target key start
LH: loop header
LB: loop body
LE: loop exit
PB: predicated region body
PF: predicated region fallthrough
CT: control target
= control target key end

     0   :  { %9 = vsyncpa [#allocation3], 0  ;;  %s271_s0 = inlined_call_operand.hbm [shape: f32[2,128], index: 0, kind: input, shape index: {}]   ;;  %s272_s1 = inlined_call_operand.hbm [shape: f32[4,128], index: 1, kind: output, shape index: {0}]   ;;  %s273_s2 = inlined_call_operand.hbm [shape: f32[4,128], index: 2, kind: output, shape index: {1}]   ;;  %s274_s3 = inlined_call_operand.hbm [shape: f32[4,128], index: 3, kind: output, shape index: {2}]  }
   0x1   :  { %10 = vsyncpa [#allocation4], 0 }
   0x2   :  { %11 = vsyncpa [#allocation7], 0  ;;  %s185_s12 = smov [#allocation2]   ;;  %s91_s16 = scalar_lea.hbm %s271_s0, 32 }
   0x3   :  { %s18_s13 = sshll.u32 %s185_s12, 4  ;;  %p92_p0 = scmp.ne.s32.totalorder %s271_s0, %s91_s16  ;;  %s19_s13 = int_to_ptr.vmem [resolvable:$true] %s18_s13 }
   0x4   :  { %p95_p1 = scmp.lt.u32.totalorder %s91_s16, %s271_s0 }
   0x6   :  { %p97_p2 = pnand %p95_p1, %p92_p0 }
   0x8   :  { %100 = shalt.err (!%p97_p2)
}
   0x9   :  { %s101_s21 = scalar_lea.vmem %s19_s13, 32  ;;  %p106_p4 = scmp.lt.s32.totalorder %s19_s13, %s19_s13 }
   0xa   :  { %p102_p3 = scmp.ne.s32.totalorder %s19_s13, %s101_s21  ;;  %p107_p5 = scmp.lt.s32.totalorder %s101_s21, %s101_s21 }
   0xc   :  { %p108_p6 = por %p107_p5, %p106_p4 }
   0xe   :  { %p109_p7 = pnand %p108_p6, %p102_p3 }
  0x10   :  { %112 = shalt.err (!%p109_p7)
}
  0x11   :  { %21 = dma.hbm_to_vmem [thread:$0]  %s271_s0, 32, %s19_s13, [#allocation3]  }
  0x12   :  { %179 = dma.done.wait [#allocation3], 32  }
  0x13   :  { %180 = vsyncadd [#allocation3], 4294967264  ;;  %v28_v0 = vlaneseq  ;;  %v25_v3 = vld [vmem:[#allocation2] sm:$0x1]  ;;  %v26_v4 = vld [vmem:[#allocation2 + $0x1] sm:$0x1] }
  0x14   :  { %s186_s24 = smov [#allocation6]   ;;  %v33_v5 = vmul.f32 %v26_v4, %v25_v3  ;;  %v27_v6 = vadd.f32 %v26_v4, %v25_v3  ;;  %v39_v7 = vsub.f32 0.0, %v25_v3  ;;  %s187_s26 = smov [#allocation5]  }
  0x15   :  { %v29_v1 = vshrl.u32 %v28_v0, 7  ;;  %s61_s25 = sshll.u32 %s186_s24, 4  ;;  %s51_s27 = sshll.u32 %s187_s26, 4  ;;  %s62_s25 = int_to_ptr.vmem [resolvable:$true] %s61_s25  ;;  %s221_s27 = int_to_ptr.vmem [resolvable:$true] %s51_s27 }
  0x16   :  { %s188_s28 = smov [#allocation8]   ;;  %s113_s0 = scalar_lea.vmem %s62_s25, 64 }
  0x17   :  { %v30_v2 = vsub.s32 0, %v29_v1  ;;  %s71_s29 = sshll.u32 %s188_s28, 4  ;;  %p114_p8 = scmp.ne.s32.totalorder %s62_s25, %s113_s0  ;;  %s223_s29 = int_to_ptr.vmem [resolvable:$true] %s71_s29 }
  0x18   :  { %p118_p9 = scmp.lt.s32.totalorder %s62_s25, %s62_s25  ;;  %p119_p10 = scmp.lt.s32.totalorder %s113_s0, %s113_s0 }
  0x19   :  { %v37_v8 = vrot.slane %v33_v5, %v30_v2  ;;  %v31_v9 = vrot.slane %v27_v6, %v30_v2  ;;  %v43_v10 = vrot.slane %v39_v7, %v30_v2 }
  0x1a   :  { %p120_p11 = por %p119_p10, %p118_p9 }
  0x1b   :  { %38 = vst [vmem:[#allocation6] sm:$0xf] %v37_v8  ;;  %32 = vst [vmem:[#allocation5] sm:$0xf] %v31_v9 }
  0x1c   :  { %44 = vst [vmem:[#allocation8] sm:$0xf] %v43_v10  ;;  %p121_p12 = pnand %p120_p11, %p114_p8 }
  0x1e   :  { %124 = shalt.err (!%p121_p12)
}
  0x1f   :  { %s125_s5 = scalar_lea.hbm %s273_s2, 64 }
  0x20   :  { %p126_p13 = scmp.ne.s32.totalorder %s273_s2, %s125_s5  ;;  %p129_p0 = scmp.lt.u32.totalorder %s125_s5, %s273_s2 }
  0x22   :  { %p131_p1 = pnand %p129_p0, %p126_p13 }
  0x24   :  { %134 = shalt.err (!%p131_p1)
}
  0x25   :  { %64 = dma.vmem_to_hbm [thread:$0]  %s62_s25, 64, %s273_s2, [#allocation7]  }
  0x26   :  { %s135_s12 = scalar_lea.vmem %s221_s27, 64  ;;  %p140_p3 = scmp.lt.s32.totalorder %s221_s27, %s221_s27 }
  0x27   :  { %p136_p2 = scmp.ne.s32.totalorder %s221_s27, %s135_s12  ;;  %p141_p4 = scmp.lt.s32.totalorder %s135_s12, %s135_s12 }
  0x29   :  { %p142_p5 = por %p141_p4, %p140_p3 }
  0x2b   :  { %p143_p6 = pnand %p142_p5, %p136_p2 }
  0x2d   :  { %146 = shalt.err (!%p143_p6)
}
  0x2e   :  { %s147_s15 = scalar_lea.hbm %s272_s1, 64 }
  0x2f   :  { %p148_p7 = scmp.ne.s32.totalorder %s272_s1, %s147_s15  ;;  %p151_p8 = scmp.lt.u32.totalorder %s147_s15, %s272_s1 }
  0x31   :  { %p153_p9 = pnand %p151_p8, %p148_p7 }
  0x33   :  { %156 = shalt.err (!%p153_p9)
}
  0x34   :  { %54 = dma.vmem_to_hbm [thread:$0]  %s221_s27, 64, %s272_s1, [#allocation4]  }
  0x35   :  { %s157_s21 = scalar_lea.vmem %s223_s29, 64  ;;  %p162_p11 = scmp.lt.s32.totalorder %s223_s29, %s223_s29 }
  0x36   :  { %p158_p10 = scmp.ne.s32.totalorder %s223_s29, %s157_s21  ;;  %p163_p12 = scmp.lt.s32.totalorder %s157_s21, %s157_s21 }
  0x38   :  { %p164_p13 = por %p163_p12, %p162_p11 }
  0x3a   :  { %p165_p0 = pnand %p164_p13, %p158_p10 }
  0x3c   :  { %168 = shalt.err (!%p165_p0)
}
  0x3d   :  { %s169_s24 = scalar_lea.hbm %s274_s3, 64 }
  0x3e   :  { %p170_p1 = scmp.ne.s32.totalorder %s274_s3, %s169_s24  ;;  %p173_p2 = scmp.lt.u32.totalorder %s169_s24, %s274_s3 }
  0x40   :  { %p175_p3 = pnand %p173_p2, %p170_p1 }
  0x42   :  { %178 = shalt.err (!%p175_p3)
}
  0x43   :  { %74 = dma.vmem_to_hbm [thread:$0]  %s223_s29, 64, %s274_s3, [#allocation7]  }
  0x44   :  { %181 = dma.done.wait [#allocation4], 64  }
  0x45   :  { %182 = vsyncadd [#allocation4], 4294967232 }
  0x46   :  { %183 = dma.done.wait [#allocation7], 128  }
  0x47   :  { %184 = vsyncadd [#allocation7], 4294967168 }
  0x48   :  { %84 = vsyncpa [#allocation3], 1 }
  0x49   :  { %85 = vsyncpa [#allocation4], 1 }
  0x4a   :  { %86 = vsyncpa [#allocation7], 1 }

</bundles_post_ra>
